<compile_context>
chip_gen: v7x
topology: tpu7x:2x2x1
jax: 0.10.0
libtpu: 0.0.40
codegen_flags: <defaults>
</compile_context>

<pallas_src>
import numpy as np
import jax
import jax.numpy as jnp
from jax.experimental import pallas as pl
from jax.experimental.pallas import tpu as pltpu

TAG_LIST = ['RBS', 'SYM', 'RP', '-LRB-', 'VBP', 'NNS', 'RRC', 'PP', 'NP-TMP', 'EX', 'NX',
            'SQ', 'POS', 'DT', 'NNP', 'WDT', 'FW', 'LST', '#', ',', 'QP', 'ADVP', 'WP',
            'VBD', 'NNPS', 'LS', 'SBAR', 'PDT', 'RBR', 'UH', '.', 'VBN', 'TO', 'X',
            'WHPP', 'SINV', 'VBZ', 'SBARQ', 'RB', 'INTJ', 'UCP', 'JJR', 'IN', 'CC', ':',
            'JJ', 'CD', "''", '$', 'PRP$', 'NN', 'WHADJP', 'VB', 'MD', 'NP', 'PRT',
            'CONJP', 'WRB', 'VBG', 'FRAG', '-RRB-', 'ADJP', 'WHNP', 'WHADVP', '``',
            'PRN', 'JJS', 'PRP', 'VP']
TAG_DICT = dict(zip(TAG_LIST, range(1, len(TAG_LIST) + 1)))
VOCAB_SIZE = len(TAG_DICT) + 1          # 70 (index 0 is padding)
DIM = 64
VOCAB_PAD = 128                         # vocab padded to one full lane width
DIM_PAD = 128                           # embedding dim padded for lane-dense stores


def _round_up(x, m):
    return ((x + m - 1) // m) * m


# ----------------------------------------------------------------------------
# Pallas kernel: batched per-span embedding-average (over L) + max-pool (over W).
# ----------------------------------------------------------------------------
def _make_tree_pool_kernel(W, Lb):
    def kernel(inv_ref, idx_ref, table_ref, out_ref):
        # inv_ref:   SMEM (1, 1) f32       1 / word_max_len (true mean divisor)
        # idx_ref:   (TS, W*Lb) int32      flattened tag ids for TS spans
        # table_ref: (V_pad, D_pad) f32    embedding table (row 0 = zeros, padding_idx)
        # out_ref:   (TS, D_pad) f32       pooled span embeddings
        idx = idx_ref[...]                                   # (TS, W*Lb)
        ts = idx.shape[0]
        vp = table_ref.shape[0]
        table = table_ref[...]                               # (V_pad, D_pad)
        inv_l = inv_ref[0, 0]                                # scalar 1/L

        lane = jax.lax.broadcasted_iota(jnp.int32, (ts, vp), 1)  # (TS, V_pad)

        pooled = None
        for w in range(W):                                   # unrolled, W is small
            # counts over the Lb tag slots of width-position w (zero ids land on the
            # zero padding row of the table, so extra bucket padding is harmless)
            counts = jnp.zeros((ts, vp), jnp.float32)
            for l in range(Lb):                              # unrolled, Lb is small
                c = w * Lb + l
                col = idx[:, c:c + 1]                        # (TS, 1)
                counts = counts + (col == lane).astype(jnp.float32)
            # fused gather + mean over L: (counts) @ table * (1/L)   [MXU]
            avg = jnp.dot(counts, table,
                          preferred_element_type=jnp.float32) * inv_l   # (TS, D_pad)
            # global_max_pool1d over the span-width axis W (running max)
            pooled = avg if pooled is None else jnp.maximum(pooled, avg)

        out_ref[...] = pooled
    return kernel


def tree_pool_pallas(tag_flat, inv_len, table_pad, W, Lb, TS):
    """tag_flat: (S_pad, W*Lb) int32, inv_len: (1,1) f32, table_pad: (Vp, Dp) f32
       -> (S_pad, Dp) f32 pooled span embeddings."""
    Sp, WLb = tag_flat.shape
    Vp, Dp = table_pad.shape
    assert WLb == W * Lb
    assert Sp % TS == 0 and TS % 8 == 0

    return pl.pallas_call(
        _make_tree_pool_kernel(W, Lb),
        out_shape=jax.ShapeDtypeStruct((Sp, Dp), jnp.float32),
        grid_spec=pltpu.PrefetchScalarGridSpec(
            num_scalar_prefetch=0,
            grid=(Sp // TS,),
            in_specs=[
                pl.BlockSpec(memory_space=pltpu.MemorySpace.SMEM),  # (1,1) 1/L scalar
                pl.BlockSpec((TS, WLb), lambda s: (s, 0)),          # TS spans per step
                pl.BlockSpec((Vp, Dp), lambda s: (0, 0)),           # full table resident
            ],
            out_specs=pl.BlockSpec((TS, Dp), lambda s: (s, 0)),     # lane-dense output
        ),
        compiler_params=pltpu.CompilerParams(
            dimension_semantics=("parallel",)),
    )(inv_len, tag_flat, table_pad)


# ----------------------------------------------------------------------------
# Forward pass (host preprocessing identical to the PyTorch module, then kernel).
# ----------------------------------------------------------------------------
def tree_embedder_forward(tree_info, spans, span_embeddings, max_span_width, table_pad):
    del span_embeddings  # only used for .device in the PyTorch code
    msw = int(max_span_width[0][0])
    num_spans = int(spans.shape[1])

    total = []
    for i in range(num_spans):
        start = int(spans[0, i, 0])
        end = int(spans[0, i, 1])
        cur_info = tree_info[start:end + 1]
        total.append([[TAG_DICT[w] for w in info['tree_list']] for info in cur_info])

    word_max_len = max(max(len(word) for word in span) for span in total)

    W = msw
    Lb = _round_up(word_max_len, 4)                 # bucket L -> stable kernel shapes
    TS = min(128, _round_up(num_spans, 8))          # spans per grid step
    S_pad = _round_up(num_spans, TS)

    # build padded (S_pad, W, Lb) id tensor; zero padding == padding_idx 0
    tags = np.zeros((S_pad, W, Lb), dtype=np.int32)
    for i, span in enumerate(total):
        for j, word in enumerate(span):
            tags[i, j, :len(word)] = word

    tag_flat = jnp.asarray(tags.reshape(S_pad, W * Lb))
    inv_len = jnp.full((1, 1), 1.0 / word_max_len, dtype=jnp.float32)

    pooled = tree_pool_pallas(tag_flat, inv_len, table_pad, W, Lb, TS)   # (S_pad, D_pad)
    out = pooled[:num_spans, :DIM].reshape(1, num_spans, DIM)            # matches PyTorch
    return out, tags[:num_spans], word_max_len


# ----------------------------------------------------------------------------
# Main
# ----------------------------------------------------------------------------
if __name__ == "__main__":
    # deterministic embedding table (padding_idx = 0 -> zero row), padded to (128, 128)
    key = jax.random.PRNGKey(0)
    table = jax.random.normal(key, (VOCAB_SIZE, DIM), dtype=jnp.float32) * 0.02
    table = table.at[0].set(0.0)
    table_pad = jnp.zeros((VOCAB_PAD, DIM_PAD), dtype=jnp.float32)
    table_pad = table_pad.at[:VOCAB_SIZE, :DIM].set(table)

    # synthetic tree_info: 8-word sentence, each word with 1-3 constituency tags
    sent_len = 8
    tree_info = []
    for i in range(sent_len):
        n_tags = 1 + (i % 3)
        word_tags = [TAG_LIST[(i * 7 + k * 3) % len(TAG_LIST)] for k in range(n_tags)]
        tree_info.append({"tree_list": word_tags})

    # spans: (1, 6, 2), widths <= max_span_width = 4
    spans = jnp.array([[[0, 1], [1, 3], [2, 2], [3, 6], [5, 7], [7, 7]]], dtype=jnp.int32)
    max_span_width = [[4]]
    span_embeddings = jnp.zeros((1, spans.shape[1], DIM), dtype=jnp.float32)  # device carrier only

    out, tag3d, word_max_len = tree_embedder_forward(
        tree_info, spans, span_embeddings, max_span_width, table_pad)
    out = jax.block_until_ready(out)

    # pure-JAX reference of the is_attention=False path
    emb = jnp.take(table_pad[:, :DIM], jnp.asarray(tag3d), axis=0)   # (S, W, Lb, D)
    avg = jnp.sum(emb, axis=2) / float(word_max_len)                 # (S, W, D)  == global_avg_pool1d
    ref = jnp.max(avg, axis=1)[None]                                 # (1, S, D)  == global_max_pool1d

    assert out.shape == (1, spans.shape[1], DIM), out.shape
    np.testing.assert_allclose(np.asarray(out), np.asarray(ref), atol=1e-5, rtol=1e-5)
    print("KERNEL_OK")
</pallas_src>

<mosaic_0001>
module attributes {stable_mosaic.version = 11 : i64} {
  func.func @kernel(%arg0: i32, %arg1: memref<1x1xf32, #tpu.memory_space<smem>>, %arg2: memref<8x16xi32, #tpu.memory_space<vmem>>, %arg3: memref<128x128xf32, #tpu.memory_space<vmem>>, %arg4: memref<8x128xf32, #tpu.memory_space<vmem>>) attributes {dimension_semantics = [#tpu.dimension_semantics<parallel>], iteration_bounds = array<i64: 1>, scalar_prefetch = 0 : i64, scratch_operands = 0 : i64, tpu.core_type = #tpu.core_type<tc>, window_params = [{transform_indices = @transform_0, window_bounds = array<i64: 1, 1>}, {transform_indices = @transform_1, window_bounds = array<i64: 8, 16>}, {pipeline_mode = #tpu.pipeline_mode<synchronous>, transform_indices = @transform_2, window_bounds = array<i64: 128, 128>}, {transform_indices = @transform_3, window_bounds = array<i64: 8, 128>}]} {
    %c0 = arith.constant 0 : index
    %c0_0 = arith.constant 0 : index
    %0 = vector.load %arg2[%c0, %c0_0] : memref<8x16xi32, #tpu.memory_space<vmem>>, vector<8x16xi32>
    %c0_1 = arith.constant 0 : index
    %c0_2 = arith.constant 0 : index
    %1 = vector.load %arg3[%c0_1, %c0_2] : memref<128x128xf32, #tpu.memory_space<vmem>>, vector<128x128xf32>
    %c0_3 = arith.constant 0 : index
    %c0_4 = arith.constant 0 : index
    %2 = memref.load %arg1[%c0_3, %c0_4] : memref<1x1xf32, #tpu.memory_space<smem>>
    %3 = tpu.iota {dimensions = array<i32: 1>} : vector<8x128xi32>
    %cst = arith.constant 0.000000e+00 : f32
    %4 = vector.broadcast %cst : f32 to vector<8x128xf32>
    %5 = vector.extract_strided_slice %0 {offsets = [0, 0], sizes = [8, 1], strides = [1, 1]} : vector<8x16xi32> to vector<8x1xi32>
    %6 = vector.broadcast %5 : vector<8x1xi32> to vector<8x128xi32>
    %7 = arith.cmpi eq, %6, %3 : vector<8x128xi32>
    %8 = arith.extui %7 : vector<8x128xi1> to vector<8x128xi32>
    %9 = arith.sitofp %8 : vector<8x128xi32> to vector<8x128xf32>
    %10 = arith.addf %4, %9 : vector<8x128xf32>
    %11 = vector.extract_strided_slice %0 {offsets = [0, 1], sizes = [8, 1], strides = [1, 1]} : vector<8x16xi32> to vector<8x1xi32>
    %12 = vector.broadcast %11 : vector<8x1xi32> to vector<8x128xi32>
    %13 = arith.cmpi eq, %12, %3 : vector<8x128xi32>
    %14 = arith.extui %13 : vector<8x128xi1> to vector<8x128xi32>
    %15 = arith.sitofp %14 : vector<8x128xi32> to vector<8x128xf32>
    %16 = arith.addf %10, %15 : vector<8x128xf32>
    %17 = vector.extract_strided_slice %0 {offsets = [0, 2], sizes = [8, 1], strides = [1, 1]} : vector<8x16xi32> to vector<8x1xi32>
    %18 = vector.broadcast %17 : vector<8x1xi32> to vector<8x128xi32>
    %19 = arith.cmpi eq, %18, %3 : vector<8x128xi32>
    %20 = arith.extui %19 : vector<8x128xi1> to vector<8x128xi32>
    %21 = arith.sitofp %20 : vector<8x128xi32> to vector<8x128xf32>
    %22 = arith.addf %16, %21 : vector<8x128xf32>
    %23 = vector.extract_strided_slice %0 {offsets = [0, 3], sizes = [8, 1], strides = [1, 1]} : vector<8x16xi32> to vector<8x1xi32>
    %24 = vector.broadcast %23 : vector<8x1xi32> to vector<8x128xi32>
    %25 = arith.cmpi eq, %24, %3 : vector<8x128xi32>
    %26 = arith.extui %25 : vector<8x128xi1> to vector<8x128xi32>
    %27 = arith.sitofp %26 : vector<8x128xi32> to vector<8x128xf32>
    %28 = arith.addf %22, %27 : vector<8x128xf32>
    %cst_5 = arith.constant dense<0.000000e+00> : vector<8x128xf32>
    %29 = tpu.matmul %28, %1, %cst_5 {dimension_numbers = #tpu.dot_dimension_numbers<[1], [0], [0], [1], [0, 0, 1, 1], [], []>} : vector<8x128xf32>, vector<128x128xf32>, vector<8x128xf32> -> vector<8x128xf32>
    %30 = vector.broadcast %2 : f32 to vector<8x128xf32>
    %31 = arith.mulf %29, %30 : vector<8x128xf32>
    %cst_6 = arith.constant 0.000000e+00 : f32
    %32 = vector.broadcast %cst_6 : f32 to vector<8x128xf32>
    %33 = vector.extract_strided_slice %0 {offsets = [0, 4], sizes = [8, 1], strides = [1, 1]} : vector<8x16xi32> to vector<8x1xi32>
    %34 = vector.broadcast %33 : vector<8x1xi32> to vector<8x128xi32>
    %35 = arith.cmpi eq, %34, %3 : vector<8x128xi32>
    %36 = arith.extui %35 : vector<8x128xi1> to vector<8x128xi32>
    %37 = arith.sitofp %36 : vector<8x128xi32> to vector<8x128xf32>
    %38 = arith.addf %32, %37 : vector<8x128xf32>
    %39 = vector.extract_strided_slice %0 {offsets = [0, 5], sizes = [8, 1], strides = [1, 1]} : vector<8x16xi32> to vector<8x1xi32>
    %40 = vector.broadcast %39 : vector<8x1xi32> to vector<8x128xi32>
    %41 = arith.cmpi eq, %40, %3 : vector<8x128xi32>
    %42 = arith.extui %41 : vector<8x128xi1> to vector<8x128xi32>
    %43 = arith.sitofp %42 : vector<8x128xi32> to vector<8x128xf32>
    %44 = arith.addf %38, %43 : vector<8x128xf32>
    %45 = vector.extract_strided_slice %0 {offsets = [0, 6], sizes = [8, 1], strides = [1, 1]} : vector<8x16xi32> to vector<8x1xi32>
    %46 = vector.broadcast %45 : vector<8x1xi32> to vector<8x128xi32>
    %47 = arith.cmpi eq, %46, %3 : vector<8x128xi32>
    %48 = arith.extui %47 : vector<8x128xi1> to vector<8x128xi32>
    %49 = arith.sitofp %48 : vector<8x128xi32> to vector<8x128xf32>
    %50 = arith.addf %44, %49 : vector<8x128xf32>
    %51 = vector.extract_strided_slice %0 {offsets = [0, 7], sizes = [8, 1], strides = [1, 1]} : vector<8x16xi32> to vector<8x1xi32>
    %52 = vector.broadcast %51 : vector<8x1xi32> to vector<8x128xi32>
    %53 = arith.cmpi eq, %52, %3 : vector<8x128xi32>
    %54 = arith.extui %53 : vector<8x128xi1> to vector<8x128xi32>
    %55 = arith.sitofp %54 : vector<8x128xi32> to vector<8x128xf32>
    %56 = arith.addf %50, %55 : vector<8x128xf32>
    %cst_7 = arith.constant dense<0.000000e+00> : vector<8x128xf32>
    %57 = tpu.matmul %56, %1, %cst_7 {dimension_numbers = #tpu.dot_dimension_numbers<[1], [0], [0], [1], [0, 0, 1, 1], [], []>} : vector<8x128xf32>, vector<128x128xf32>, vector<8x128xf32> -> vector<8x128xf32>
    %58 = vector.broadcast %2 : f32 to vector<8x128xf32>
    %59 = arith.mulf %57, %58 : vector<8x128xf32>
    %60 = arith.maximumf %31, %59 : vector<8x128xf32>
    %cst_8 = arith.constant 0.000000e+00 : f32
    %61 = vector.broadcast %cst_8 : f32 to vector<8x128xf32>
    %62 = vector.extract_strided_slice %0 {offsets = [0, 8], sizes = [8, 1], strides = [1, 1]} : vector<8x16xi32> to vector<8x1xi32>
    %63 = vector.broadcast %62 : vector<8x1xi32> to vector<8x128xi32>
    %64 = arith.cmpi eq, %63, %3 : vector<8x128xi32>
    %65 = arith.extui %64 : vector<8x128xi1> to vector<8x128xi32>
    %66 = arith.sitofp %65 : vector<8x128xi32> to vector<8x128xf32>
    %67 = arith.addf %61, %66 : vector<8x128xf32>
    %68 = vector.extract_strided_slice %0 {offsets = [0, 9], sizes = [8, 1], strides = [1, 1]} : vector<8x16xi32> to vector<8x1xi32>
    %69 = vector.broadcast %68 : vector<8x1xi32> to vector<8x128xi32>
    %70 = arith.cmpi eq, %69, %3 : vector<8x128xi32>
    %71 = arith.extui %70 : vector<8x128xi1> to vector<8x128xi32>
    %72 = arith.sitofp %71 : vector<8x128xi32> to vector<8x128xf32>
    %73 = arith.addf %67, %72 : vector<8x128xf32>
    %74 = vector.extract_strided_slice %0 {offsets = [0, 10], sizes = [8, 1], strides = [1, 1]} : vector<8x16xi32> to vector<8x1xi32>
    %75 = vector.broadcast %74 : vector<8x1xi32> to vector<8x128xi32>
    %76 = arith.cmpi eq, %75, %3 : vector<8x128xi32>
    %77 = arith.extui %76 : vector<8x128xi1> to vector<8x128xi32>
    %78 = arith.sitofp %77 : vector<8x128xi32> to vector<8x128xf32>
    %79 = arith.addf %73, %78 : vector<8x128xf32>
    %80 = vector.extract_strided_slice %0 {offsets = [0, 11], sizes = [8, 1], strides = [1, 1]} : vector<8x16xi32> to vector<8x1xi32>
    %81 = vector.broadcast %80 : vector<8x1xi32> to vector<8x128xi32>
    %82 = arith.cmpi eq, %81, %3 : vector<8x128xi32>
    %83 = arith.extui %82 : vector<8x128xi1> to vector<8x128xi32>
    %84 = arith.sitofp %83 : vector<8x128xi32> to vector<8x128xf32>
    %85 = arith.addf %79, %84 : vector<8x128xf32>
    %cst_9 = arith.constant dense<0.000000e+00> : vector<8x128xf32>
    %86 = tpu.matmul %85, %1, %cst_9 {dimension_numbers = #tpu.dot_dimension_numbers<[1], [0], [0], [1], [0, 0, 1, 1], [], []>} : vector<8x128xf32>, vector<128x128xf32>, vector<8x128xf32> -> vector<8x128xf32>
    %87 = vector.broadcast %2 : f32 to vector<8x128xf32>
    %88 = arith.mulf %86, %87 : vector<8x128xf32>
    %89 = arith.maximumf %60, %88 : vector<8x128xf32>
    %cst_10 = arith.constant 0.000000e+00 : f32
    %90 = vector.broadcast %cst_10 : f32 to vector<8x128xf32>
    %91 = vector.extract_strided_slice %0 {offsets = [0, 12], sizes = [8, 1], strides = [1, 1]} : vector<8x16xi32> to vector<8x1xi32>
    %92 = vector.broadcast %91 : vector<8x1xi32> to vector<8x128xi32>
    %93 = arith.cmpi eq, %92, %3 : vector<8x128xi32>
    %94 = arith.extui %93 : vector<8x128xi1> to vector<8x128xi32>
    %95 = arith.sitofp %94 : vector<8x128xi32> to vector<8x128xf32>
    %96 = arith.addf %90, %95 : vector<8x128xf32>
    %97 = vector.extract_strided_slice %0 {offsets = [0, 13], sizes = [8, 1], strides = [1, 1]} : vector<8x16xi32> to vector<8x1xi32>
    %98 = vector.broadcast %97 : vector<8x1xi32> to vector<8x128xi32>
    %99 = arith.cmpi eq, %98, %3 : vector<8x128xi32>
    %100 = arith.extui %99 : vector<8x128xi1> to vector<8x128xi32>
    %101 = arith.sitofp %100 : vector<8x128xi32> to vector<8x128xf32>
    %102 = arith.addf %96, %101 : vector<8x128xf32>
    %103 = vector.extract_strided_slice %0 {offsets = [0, 14], sizes = [8, 1], strides = [1, 1]} : vector<8x16xi32> to vector<8x1xi32>
    %104 = vector.broadcast %103 : vector<8x1xi32> to vector<8x128xi32>
    %105 = arith.cmpi eq, %104, %3 : vector<8x128xi32>
    %106 = arith.extui %105 : vector<8x128xi1> to vector<8x128xi32>
    %107 = arith.sitofp %106 : vector<8x128xi32> to vector<8x128xf32>
    %108 = arith.addf %102, %107 : vector<8x128xf32>
    %109 = vector.extract_strided_slice %0 {offsets = [0, 15], sizes = [8, 1], strides = [1, 1]} : vector<8x16xi32> to vector<8x1xi32>
    %110 = vector.broadcast %109 : vector<8x1xi32> to vector<8x128xi32>
    %111 = arith.cmpi eq, %110, %3 : vector<8x128xi32>
    %112 = arith.extui %111 : vector<8x128xi1> to vector<8x128xi32>
    %113 = arith.sitofp %112 : vector<8x128xi32> to vector<8x128xf32>
    %114 = arith.addf %108, %113 : vector<8x128xf32>
    %cst_11 = arith.constant dense<0.000000e+00> : vector<8x128xf32>
    %115 = tpu.matmul %114, %1, %cst_11 {dimension_numbers = #tpu.dot_dimension_numbers<[1], [0], [0], [1], [0, 0, 1, 1], [], []>} : vector<8x128xf32>, vector<128x128xf32>, vector<8x128xf32> -> vector<8x128xf32>
    %116 = vector.broadcast %2 : f32 to vector<8x128xf32>
    %117 = arith.mulf %115, %116 : vector<8x128xf32>
    %118 = arith.maximumf %89, %117 : vector<8x128xf32>
    %c0_12 = arith.constant 0 : index
    %c0_13 = arith.constant 0 : index
    %119 = vector.load %arg4[%c0_12, %c0_13] : memref<8x128xf32, #tpu.memory_space<vmem>>, vector<8x128xf32>
    tpu.vector_store %arg4[%c0_12, %c0_13], %118 {strides = array<i32>} : memref<8x128xf32, #tpu.memory_space<vmem>>, vector<8x128xf32>,
    return
  }
  func.func @transform_0(%arg0: i32) -> (i32, i32) {
    %c0_i32 = arith.constant 0 : i32
    %c0_i32_0 = arith.constant 0 : i32
    %c0_i32_1 = arith.constant 0 : i32
    return %c0_i32, %c0_i32_0 : i32, i32
  }
  func.func @transform_1(%arg0: i32) -> (i32, i32) {
    %c0_i32 = arith.constant 0 : i32
    %c0_i32_0 = arith.constant 0 : i32
    return %arg0, %c0_i32 : i32, i32
  }
  func.func @transform_2(%arg0: i32) -> (i32, i32) {
    %c0_i32 = arith.constant 0 : i32
    %c0_i32_0 = arith.constant 0 : i32
    %c0_i32_1 = arith.constant 0 : i32
    return %c0_i32, %c0_i32_0 : i32, i32
  }
  func.func @transform_3(%arg0: i32) -> (i32, i32) {
    %c0_i32 = arith.constant 0 : i32
    %c0_i32_0 = arith.constant 0 : i32
    return %arg0, %c0_i32 : i32, i32
  }
}

</mosaic_0001>

<bundles_post_ra>
// kernel: tpu_custom_call.1
= control target key start
LH: loop header
LB: loop body
LE: loop exit
PB: predicated region body
PF: predicated region fallthrough
CT: control target
= control target key end

     0   :  { %9 = vsyncpa [#allocation4], 0  ;;  %s1142_s0 = inlined_call_operand.<no memory space> [shape: f32[1,1], index: 0, kind: input, shape index: {}]   ;;  %s1143_s1 = inlined_call_operand.hbm [shape: s32[8,16], index: 1, kind: input, shape index: {}]   ;;  %s1144_s2 = inlined_call_operand.hbm [shape: f32[128,128], index: 2, kind: input, shape index: {}]   ;;  %s1145_s3 = inlined_call_operand.hbm [shape: f32[8,128], index: 3, kind: output, shape index: {}]  }
   0x1   :  { %10 = vsyncpa [#allocation7], 0 }
   0x2   :  { %11 = vsyncpa [#allocation5], 0  ;;  %s912_s12 = smov [#allocation3]   ;;  %s913_s14 = smov [#allocation6]  }
   0x3   :  { %s20_s13 = sshll.u32 %s912_s12, 4  ;;  %s29_s15 = sshll.u32 %s913_s14, 4  ;;  %s21_s13 = int_to_ptr.vmem [resolvable:$true] %s20_s13  ;;  %s956_s15 = int_to_ptr.vmem [resolvable:$true] %s29_s15 }
   0x4   :  { %s840_s18 = scalar_lea.hbm %s1143_s1, 128 }
   0x5   :  { %p841_p0 = scmp.ne.s32.totalorder %s1143_s1, %s840_s18  ;;  %p844_p1 = scmp.lt.u32.totalorder %s840_s18, %s1143_s1 }
   0x7   :  { %p846_p2 = pnand %p844_p1, %p841_p0 }
   0x9   :  { %849 = shalt.err (!%p846_p2)
}
   0xa   :  { %s850_s23 = scalar_lea.vmem %s21_s13, 128  ;;  %p855_p4 = scmp.lt.s32.totalorder %s21_s13, %s21_s13 }
   0xb   :  { %p851_p3 = scmp.ne.s32.totalorder %s21_s13, %s850_s23  ;;  %p856_p5 = scmp.lt.s32.totalorder %s850_s23, %s850_s23 }
   0xd   :  { %p857_p6 = por %p856_p5, %p855_p4 }
   0xf   :  { %p858_p7 = pnand %p857_p6, %p851_p3 }
  0x11   :  { %861 = shalt.err (!%p858_p7)
}
  0x12   :  { %23 = dma.hbm_to_vmem [thread:$0]  %s1143_s1, 128, %s21_s13, [#allocation4]  }
  0x13   :  { %s862_s28 = scalar_lea.hbm %s1144_s2, 2048 }
  0x14   :  { %p863_p8 = scmp.ne.s32.totalorder %s1144_s2, %s862_s28  ;;  %p866_p9 = scmp.lt.u32.totalorder %s862_s28, %s1144_s2 }
  0x16   :  { %p868_p10 = pnand %p866_p9, %p863_p8 }
  0x18   :  { %871 = shalt.err (!%p868_p10)
}
  0x19   :  { %s872_s6 = scalar_lea.vmem %s956_s15, 2048  ;;  %p877_p12 = scmp.lt.s32.totalorder %s956_s15, %s956_s15 }
  0x1a   :  { %p873_p11 = scmp.ne.s32.totalorder %s956_s15, %s872_s6  ;;  %p878_p13 = scmp.lt.s32.totalorder %s872_s6, %s872_s6 }
  0x1c   :  { %p879_p0 = por %p878_p13, %p877_p12 }
  0x1e   :  { %p880_p1 = pnand %p879_p0, %p873_p11 }
  0x20   :  { %883 = shalt.err (!%p880_p1)
}
  0x21   :  { %s914_s1 = smov 128   ;;  %s915_s7 = smov 8  }
  0x22   :  { %35 = dma.hbm_to_vmem [thread:$0]  %s1144_s2, 2048, %s956_s15, [#allocation7], %s914_s1, %s914_s1, %s915_s7  }
  0x23   :  { %906 = dma.done.wait [#allocation4], 128  }
  0x24   :  { %907 = vsyncadd [#allocation4], 4294967168 }
  0x25   :  { %908 = dma.done.wait [#allocation7], 2048  }
  0x26   :  { %909 = vsyncadd [#allocation7], 4294965248  ;;  %v916_v0 = vmov 2   ;;  %v917_v1 = vmov 0   ;;  %v918_v2 = vmov 0.0|0.0   ;;  %v989_v3 = vld [vmem:[#allocation3] sm:$0xff]  ;;  %v60_v43 = vlaneseq }
  0x27   :  { %825 = vset.pattern.permute.xlu1 %v916_v0  ;;  %823 = vset.pattern.permute.xlu0 %v917_v1  ;;  %v43_v4 = vld [vmem:[#allocation6] sm:$0xff]  ;;  %v44_v5 = vld [vmem:[#allocation6 + $0x8] sm:$0xff]  ;;  %v45_v7 = vld [vmem:[#allocation6 + $0x10] sm:$0xff]  ;;  %v919_v10 = vmov 4   ;;  %v920_v11 = vmov 1   ;;  %v921_v15 = vmov 5  }
  0x28   :  { %703 = vmatprep.subr.bf16.mxu0 %v918_v2  ;;  %727 = vmatprep.subr.bf16.mxu1 %v918_v2  ;;  %v993_v6 = vpack.c.bf16 %v44_v5, %v43_v4  ;;  %v46_v8 = vld [vmem:[#allocation6 + $0x18] sm:$0xff]  ;;  %v47_v12 = vld [vmem:[#allocation6 + $0x20] sm:$0xff]  ;;  %v48_v13 = vld [vmem:[#allocation6 + $0x28] sm:$0xff]  ;;  %v922_v16 = vmov 3   ;;  %vm923_vm0 = vmmov 0   ;;  %v924_v20 = vmov 0.0  }
  0x29   :  { %77 = vperm.xlu1 %825, %v989_v3   ;;  %63 = vperm.xlu0 %823, %v989_v3   ;;  %v996_v9 = vpack.c.bf16 %v46_v8, %v45_v7  ;;  %v1006_v14 = vpack.c.bf16 %v48_v13, %v47_v12  ;;  %v49_v17 = vld [vmem:[#allocation6 + $0x30] sm:$0xff]  ;;  %v50_v18 = vld [vmem:[#allocation6 + $0x38] sm:$0xff]  ;;  %v925_v21 = vmov 6   ;;  %v926_v22 = vmov 8   ;;  %v51_v23 = vld [vmem:[#allocation6 + $0x40] sm:$0xff]  ;;  %s935_s11 = smov [#allocation8]  }
  0x2a   :  { %705 = vmatpush3.bf16.msra.mxu0 %v993_v6  ;;  %729 = vmatpush3.bf16.msra.mxu1 %v993_v6  ;;  %v1014_v19 = vpack.c.bf16 %v50_v18, %v49_v17  ;;  %v52_v24 = vld [vmem:[#allocation6 + $0x48] sm:$0xff]  ;;  %v927_v26 = vmov 7   ;;  %v928_v27 = vmov 12   ;;  %v53_v28 = vld [vmem:[#allocation6 + $0x50] sm:$0xff]  ;;  %v54_v29 = vld [vmem:[#allocation6 + $0x58] sm:$0xff]  ;;  %v929_v33 = vmov 9  }
  0x2b   :  { %706 = vmatprep.subr.bf16.mxu0 %v918_v2  ;;  %730 = vmatprep.subr.bf16.mxu1 %v918_v2  ;;  %v1026_v25 = vpack.c.bf16 %v52_v24, %v51_v23  ;;  %v1034_v30 = vpack.c.bf16 %v54_v29, %v53_v28  ;;  %v55_v31 = vld [vmem:[#allocation6 + $0x60] sm:$0xff]  ;;  %v56_v32 = vld [vmem:[#allocation6 + $0x68] sm:$0xff]  ;;  %v930_v34 = vmov 14   ;;  %v57_v36 = vld [vmem:[#allocation6 + $0x70] sm:$0xff]  ;;  %v931_v38 = vmov 10   ;;  %s469_s12 = sshll.u32 %s935_s11, 4  ;;  %s470_s12 = int_to_ptr.vmem [resolvable:$true] %s469_s12 }
  0x2c   :  { %595 = vmatprep.mubr.msk.f32.mxu0 %vm923_vm0, %v924_v20  ;;  %630 = vmatprep.mubr.msk.f32.mxu1 %vm923_vm0, %v924_v20  ;;  %v1040_v35 = vpack.c.bf16 %v56_v32, %v55_v31  ;;  %v58_v37 = vld [vmem:[#allocation6 + $0x78] sm:$0xff]  ;;  %v932_v39 = vmov 15   ;;  %v933_v41 = vmov 13   ;;  %v934_v42 = vmov 11   ;;  %s884_s13 = scalar_lea.vmem %s470_s12, 128  ;;  %p889_p3 = scmp.lt.s32.totalorder %s470_s12, %s470_s12 }
  0x2d   :  { %826 = vset.pattern.permute.xlu1 %v919_v10  ;;  %824 = vset.pattern.permute.xlu0 %v920_v11  ;;  %v1047_v40 = vpack.c.bf16 %v58_v37, %v57_v36  ;;  %v1059_v44 = vand.u32 127, %v60_v43  ;;  %v160_v29 = vstv %s1142_s0  ;;  %p885_p2 = scmp.ne.s32.totalorder %s470_s12, %s884_s13  ;;  %p890_p4 = scmp.lt.s32.totalorder %s884_s13, %s884_s13 }
  0x2e   :  { %163 = vperm.xlu1 %826, %v989_v3   ;;  %70 = vperm.xlu0 %824, %v989_v3  }
  0x2f   :  { %708 = vmatpush3.bf16.msra.mxu0 %v996_v9  ;;  %732 = vmatpush3.bf16.msra.mxu1 %v996_v9  ;;  %p891_p5 = por %p890_p4, %p889_p3 }
  0x30   :  { %709 = vmatprep.subr.bf16.mxu0 %v918_v2  ;;  %733 = vmatprep.subr.bf16.mxu1 %v918_v2 }
  0x31   :  { %p892_p6 = pnand %p891_p5, %p885_p2 }
  0x32   :  { %827 = vset.pattern.permute.xlu1 %v921_v15  ;;  %828 = vset.pattern.permute.xlu0 %v922_v16 }
  0x33   :  { %170 = vperm.xlu1 %827, %v989_v3   ;;  %84 = vperm.xlu0 %828, %v989_v3  }
  0x34   :  { %711 = vmatpush3.bf16.msra.mxu0 %v1006_v14  ;;  %735 = vmatpush3.bf16.msra.mxu1 %v1006_v14 }
  0x35   :  { %712 = vmatprep.subr.bf16.mxu0 %v918_v2  ;;  %736 = vmatprep.subr.bf16.mxu1 %v918_v2 }
  0x37   :  { %829 = vset.pattern.permute.xlu1 %v925_v21  ;;  %831 = vset.pattern.permute.xlu0 %v926_v22 }
  0x38   :  { %177 = vperm.xlu1 %829, %v989_v3   ;;  %263 = vperm.xlu0 %831, %v989_v3  }
  0x39   :  { %714 = vmatpush3.bf16.msra.mxu0 %v1014_v19  ;;  %738 = vmatpush3.bf16.msra.mxu1 %v1014_v19 }
  0x3a   :  { %715 = vmatprep.subr.bf16.mxu0 %v918_v2  ;;  %739 = vmatprep.subr.bf16.mxu1 %v918_v2 }
  0x3c   :  { %830 = vset.pattern.permute.xlu1 %v927_v26  ;;  %834 = vset.pattern.permute.xlu0 %v928_v27 }
  0x3d   :  { %184 = vperm.xlu1 %830, %v989_v3   ;;  %363 = vperm.xlu0 %834, %v989_v3  }
  0x3e   :  { %717 = vmatpush3.bf16.msra.mxu0 %v1026_v25  ;;  %741 = vmatpush3.bf16.msra.mxu1 %v1026_v25 }
  0x3f   :  { %718 = vmatprep.subr.bf16.mxu0 %v918_v2  ;;  %742 = vmatprep.subr.bf16.mxu1 %v918_v2 }
  0x41   :  { %832 = vset.pattern.permute.xlu1 %v929_v33  ;;  %837 = vset.pattern.permute.xlu0 %v930_v34 }
  0x42   :  { %270 = vperm.xlu1 %832, %v989_v3   ;;  %377 = vperm.xlu0 %837, %v989_v3  }
  0x43   :  { %720 = vmatpush3.bf16.msra.mxu0 %v1034_v30  ;;  %744 = vmatpush3.bf16.msra.mxu1 %v1034_v30 }
  0x44   :  { %721 = vmatprep.subr.bf16.mxu0 %v918_v2  ;;  %745 = vmatprep.subr.bf16.mxu1 %v918_v2 }
  0x46   :  { %833 = vset.pattern.permute.xlu1 %v931_v38  ;;  %839 = vset.pattern.permute.xlu0 %v932_v39 }
  0x47   :  { %277 = vperm.xlu1 %833, %v989_v3   ;;  %723 = vmatpush3.bf16.msra.mxu0 %v1040_v35 }
  0x48   :  { %724 = vmatprep.subr.bf16.mxu0 %v918_v2  ;;  %747 = vmatpush3.bf16.msra.mxu1 %v1040_v35 }
  0x49   :  { %748 = vmatprep.subr.bf16.mxu1 %v918_v2 }
  0x4b   :  { %835 = vset.pattern.permute.xlu1 %v933_v41  ;;  %726 = vmatpush3.bf16.msra.mxu0 %v1047_v40 }
  0x4c   :  { %370 = vperm.xlu1 %835, %v989_v3   ;;  %751 = vmatprep.subr.bf16.mxu0 %v918_v2 }
  0x4d   :  { %750 = vmatpush3.bf16.msra.mxu1 %v1047_v40 }
  0x4e   :  { %775 = vmatprep.subr.bf16.mxu1 %v918_v2 }
  0x50   :  { %836 = vset.pattern.permute.xlu1 %v934_v42 }
  0x51   :  { %284 = vperm.xlu1 %836, %v989_v3  }
  0x55   :  { %838 = vset.pattern.permute.xlu1 %v932_v39 }
  0x56   :  { %384 = vperm.xlu1 %838, %v989_v3  }
  0xa8   :  { %v78_v45 = vpop.permute.xlu1 %77  ;;  %v64_v46 = vpop.permute.xlu0 %63 }
  0xa9   :  { %vm65_vm1 = vcmp.eq.s32.totalorder %v64_v46, %v1059_v44  ;;  %vm79_vm2 = vcmp.eq.s32.totalorder %v78_v45, %v1059_v44 }
  0xaa   :  { %v479_v47 = vsel %vm65_vm1, 1.0, %v924_v20  ;;  %v481_v52 = vsel %vm79_vm2, 1.0, %v924_v20 }
  0xad   :  { %v164_v48 = vpop.permute.xlu1 %163  ;;  %v71_v49 = vpop.permute.xlu0 %70 }
  0xae   :  { %vm72_vm3 = vcmp.eq.s32.totalorder %v71_v49, %v1059_v44  ;;  %vm165_vm6 = vcmp.eq.s32.totalorder %v164_v48, %v1059_v44 }
  0xaf   :  { %v480_v50 = vsel %vm72_vm3, 1.0, %v924_v20  ;;  %v483_v60 = vsel %vm165_vm6, 1.0, %v924_v20 }
  0xb0   :  { %v75_v51 = vadd.f32 %v480_v50, %v479_v47 }
  0xb2   :  { %v171_v53 = vpop.permute.xlu1 %170  ;;  %v82_v54 = vadd.f32 %v481_v52, %v75_v51  ;;  %v85_v55 = vpop.permute.xlu0 %84 }
  0xb3   :  { %vm86_vm4 = vcmp.eq.s32.totalorder %v85_v55, %v1059_v44  ;;  %vm172_vm5 = vcmp.eq.s32.totalorder %v171_v53, %v1059_v44 }
  0xb4   :  { %v482_v56 = vsel %vm86_vm4, 1.0, %v924_v20  ;;  %v484_v59 = vsel %vm172_vm5, 1.0, %v924_v20 }
  0xb5   :  { %v89_v57 = vadd.f32 %v482_v56, %v82_v54  ;;  %v175_v62 = vadd.f32 %v484_v59, %v483_v60 }
  0xb7   :  { %v178_v58 = vpop.permute.xlu1 %177  ;;  %596 = vmatmul.mubr.f32.vlgmr.msra.gmra.mrb[0].mxu0 %v89_v57  ;;  %v264_v5 = vpop.permute.xlu0 %263 }
  0xb8   :  { %vm179_vm7 = vcmp.eq.s32.totalorder %v178_v58, %v1059_v44  ;;  %753 = vmatpush3.bf16.msra.mxu0 %v993_v6  ;;  %665 = vmatprep.mubr.msk.f32.mxu0 %vm923_vm0, %v924_v20  ;;  %vm265_vm10 = vcmp.eq.s32.totalorder %v264_v5, %v1059_v44 }
  0xb9   :  { %754 = vmatprep.subr.bf16.mxu0 %v918_v2  ;;  %v485_v61 = vsel %vm179_vm7, 1.0, %v924_v20  ;;  %v487_v8 = vsel %vm265_vm10, 1.0, %v924_v20 }
  0xba   :  { %v182_v0 = vadd.f32 %v485_v61, %v175_v62 }
  0xbc   :  { %756 = vmatpush3.bf16.msra.mxu0 %v996_v9  ;;  %v185_v63 = vpop.permute.xlu1 %184  ;;  %v364_v10 = vpop.permute.xlu0 %363 }
  0xbd   :  { %vm186_vm8 = vcmp.eq.s32.totalorder %v185_v63, %v1059_v44  ;;  %757 = vmatprep.subr.bf16.mxu0 %v918_v2  ;;  %vm365_vm13 = vcmp.eq.s32.totalorder %v364_v10, %v1059_v44 }
  0xbe   :  { %v486_v1 = vsel %vm186_vm8, 1.0, %v924_v20 }
  0xbf   :  { %v189_v3 = vadd.f32 %v486_v1, %v182_v0 }
  0xc0   :  { %759 = vmatpush3.bf16.msra.mxu0 %v1006_v14 }
  0xc1   :  { %631 = vmatmul.mubr.f32.vlgmr.msra.gmra.mrb[0].mxu1 %v189_v3  ;;  %760 = vmatprep.subr.bf16.mxu0 %v918_v2  ;;  %v271_v4 = vpop.permute.xlu1 %270  ;;  %v378_v16 = vpop.permute.xlu0 %377 }
  0xc2   :  { %777 = vmatpush3.bf16.msra.mxu1 %v993_v6  ;;  %700 = vmatprep.mubr.msk.f32.mxu1 %vm923_vm0, %v924_v20  ;;  %vm272_vm9 = vcmp.eq.s32.totalorder %v271_v4, %v1059_v44  ;;  %vm379_vm15 = vcmp.eq.s32.totalorder %v378_v16, %v1059_v44 }
  0xc3   :  { %778 = vmatprep.subr.bf16.mxu1 %v918_v2  ;;  %v488_v6 = vsel %vm272_vm9, 1.0, %v924_v20  ;;  %v493_v23 = vsel %vm379_vm15, 1.0, %v924_v20 }
  0xc4   :  { %762 = vmatpush3.bf16.msra.mxu0 %v1014_v19  ;;  %v275_v11 = vadd.f32 %v488_v6, %v487_v8 }
  0xc5   :  { %763 = vmatprep.subr.bf16.mxu0 %v918_v2 }
  0xc6   :  { %780 = vmatpush3.bf16.msra.mxu1 %v996_v9  ;;  %v278_v7 = vpop.permute.xlu1 %277 }
  0xc7   :  { %781 = vmatprep.subr.bf16.mxu1 %v918_v2  ;;  %vm279_vm11 = vcmp.eq.s32.totalorder %v278_v7, %v1059_v44 }
  0xc8   :  { %765 = vmatpush3.bf16.msra.mxu0 %v1026_v25  ;;  %v489_v12 = vsel %vm279_vm11, 1.0, %v924_v20 }
  0xc9   :  { %766 = vmatprep.subr.bf16.mxu0 %v918_v2 }
  0xca   :  { %783 = vmatpush3.bf16.msra.mxu1 %v1006_v14  ;;  %v282_v14 = vadd.f32 %v489_v12, %v275_v11 }
  0xcb   :  { %784 = vmatprep.subr.bf16.mxu1 %v918_v2  ;;  %v371_v9 = vpop.permute.xlu1 %370 }
  0xcc   :  { %768 = vmatpush3.bf16.msra.mxu0 %v1034_v30  ;;  %vm372_vm12 = vcmp.eq.s32.totalorder %v371_v9, %v1059_v44 }
  0xcd   :  { %769 = vmatprep.subr.bf16.mxu0 %v918_v2  ;;  %v492_v18 = vsel %vm372_vm12, 1.0, %v924_v20 }
  0xce   :  { %786 = vmatpush3.bf16.msra.mxu1 %v1014_v19  ;;  %v491_v19 = vsel %vm365_vm13, 1.0, %v924_v20 }
  0xcf   :  { %787 = vmatprep.subr.bf16.mxu1 %v918_v2  ;;  %v375_v22 = vadd.f32 %v492_v18, %v491_v19 }
  0xd0   :  { %771 = vmatpush3.bf16.msra.mxu0 %v1040_v35  ;;  %v285_v13 = vpop.permute.xlu1 %284 }
  0xd1   :  { %vm286_vm14 = vcmp.eq.s32.totalorder %v285_v13, %v1059_v44  ;;  %772 = vmatprep.subr.bf16.mxu0 %v918_v2  ;;  %v382_v24 = vadd.f32 %v493_v23, %v375_v22 }
  0xd2   :  { %v490_v15 = vsel %vm286_vm14, 1.0, %v924_v20  ;;  %789 = vmatpush3.bf16.msra.mxu1 %v1026_v25 }
  0xd3   :  { %v289_v17 = vadd.f32 %v490_v15, %v282_v14  ;;  %790 = vmatprep.subr.bf16.mxu1 %v918_v2 }
  0xd4   :  { %774 = vmatpush3.bf16.msra.mxu0 %v1047_v40 }
  0xd5   :  { %v385_v21 = vpop.permute.xlu1 %384 }
  0xd6   :  { %792 = vmatpush3.bf16.msra.mxu1 %v1034_v30  ;;  %vm386_vm0 = vcmp.eq.s32.totalorder %v385_v21, %v1059_v44 }
  0xd7   :  { %666 = vmatmul.mubr.f32.vlgmr.msra.gmra.mrb[2].mxu0 %v289_v17  ;;  %793 = vmatprep.subr.bf16.mxu1 %v918_v2  ;;  %v494_v25 = vsel %vm386_vm0, 1.0, %v924_v20 }
  0xd8   :  { %v389_v26 = vadd.f32 %v494_v25, %v382_v24 }
  0xda   :  { %795 = vmatpush3.bf16.msra.mxu1 %v1040_v35 }
  0xdb   :  { %796 = vmatprep.subr.bf16.mxu1 %v918_v2 }
  0xde   :  { %798 = vmatpush3.bf16.msra.mxu1 %v1047_v40 }
  0xe1   :  { %701 = vmatmul.mubr.f32.vlgmr.msra.gmra.mrb[2].mxu1 %v389_v26 }
 0x18a   :  { %v156_v27 = vpop.f32.mrb[0].mxu0 }
 0x18b   :  { %v597_v28 = vpop.f32.mrb[1].mxu0  ;;  %v161_v31 = vmul.f32 %v160_v29, %v156_v27 }
 0x194   :  { %v256_v30 = vpop.f32.mrb[0].mxu1 }
 0x195   :  { %v260_v32 = vmul.f32 %v256_v30, %v160_v29  ;;  %v632_v33 = vpop.f32.mrb[1].mxu1 }
 0x197   :  { %v261_v34 = vmax.f32 %v161_v31, %v260_v32 }
 0x1aa   :  { %v356_v35 = vpop.f32.mrb[2].mxu0 }
 0x1ab   :  { %v360_v36 = vmul.f32 %v356_v35, %v160_v29  ;;  %v667_v2 = vpop.f32.mrb[3].mxu0 }
 0x1ad   :  { %v361_v37 = vmax.f32 %v261_v34, %v360_v36 }
 0x1b4   :  { %v456_v20 = vpop.f32.mrb[2].mxu1 }
 0x1b5   :  { %v460_v38 = vmul.f32 %v456_v20, %v160_v29  ;;  %v702_v39 = vpop.f32.mrb[3].mxu1 }
 0x1b7   :  { %v461_v40 = vmax.f32 %v361_v37, %v460_v38 }
 0x1b9   :  { %462 = vst [vmem:[#allocation8] sm:$0xff] %v461_v40 }
 0x1ba   :  { %895 = shalt.err (!%p892_p6)
}
 0x1bb   :  { %s896_s15 = scalar_lea.hbm %s1145_s3, 128 }
 0x1bc   :  { %p897_p7 = scmp.ne.s32.totalorder %s1145_s3, %s896_s15  ;;  %p900_p8 = scmp.lt.u32.totalorder %s896_s15, %s1145_s3 }
 0x1be   :  { %p902_p9 = pnand %p900_p8, %p897_p7 }
 0x1c0   :  { %905 = shalt.err (!%p902_p9)
}
 0x1c1   :  { %472 = dma.vmem_to_hbm [thread:$0]  %s470_s12, 128, %s1145_s3, [#allocation5]  }
 0x1c2   :  { %910 = dma.done.wait [#allocation5], 128  }
 0x1c3   :  { %911 = vsyncadd [#allocation5], 4294967168 }
 0x1c4   :  { %476 = vsyncpa [#allocation4], 1 }
 0x1c5   :  { %477 = vsyncpa [#allocation7], 1 }
 0x1c6   :  { %478 = vsyncpa [#allocation5], 1 }

</bundles_post_ra>
